<compile_context>
chip_gen: v6e
topology: v6e:2x2x1
jax: 0.10.0
libtpu: 0.0.40
codegen_flags: <defaults>
</compile_context>

<pallas_src>
import functools

import jax
import jax.numpy as jnp
from jax.experimental import pallas as pl
from jax.experimental.pallas import tpu as pltpu

_LANES = 128
_SUBLANES = 8
_GRP = _SUBLANES * _LANES  # elements per (8, 128) tile


def _round_up(x, m):
    return (x + m - 1) // m * m


def _tpu_config():
    """Generation-aware (num_tensorcores, block budget bytes, vmem limit bytes)."""
    vmem_cap = None
    try:
        vmem_cap = getattr(pltpu.get_tpu_info(), "vmem_capacity_bytes", None)
    except Exception:
        vmem_cap = None
    try:
        kind = jax.devices()[0].device_kind.lower()
    except Exception:
        kind = ""
    # v5e / v6e expose a single TensorCore; only v7x-class parts have two.
    two_cores = "v7" in kind
    big_vmem = (vmem_cap is not None) and vmem_cap >= 100 * 1024 * 1024
    if big_vmem:
        # 128 MiB physical VMEM (v5e / v6e): big double-buffered blocks.
        budget, limit = 32 * 1024 * 1024, 96 * 1024 * 1024
    else:
        # 64 MiB per TC (v7x) or unknown chip: stay conservative.
        budget, limit = 16 * 1024 * 1024, 48 * 1024 * 1024
    return (2 if two_cores else 1), budget, limit


def _choose_grps_per_block(n, c, g, itemsize, budget_bytes):
    """Number of (8,128) tiles per grid step, sized from a VMEM budget."""
    # Per tile of the G axis: double-buffered inputs (3 full-C + 2 single-C
    # tensors) in their native dtype, plus ~6 live f32 (B,8,128) temporaries
    # inside the unrolled (i, j) loop of the kernel body.
    per_grp = 2 * (3 * n * c + 2 * n) * _GRP * itemsize + 6 * _GRP * 4
    return max(1, min(budget_bytes // per_grp, g))


def _alpha_matte_loss_kernel(alpha_ref, trimap_ref, fg_ref, bg_ref, tgt_ref,
                             out_ref, *, n, c, grps_per_block, steps_per_slice,
                             total_grps, tail_possible):
    step = pl.program_id(1)
    blk = pl.program_id(0) * steps_per_slice + step   # logical block index

    @pl.when(step == 0)
    def _init():
        out_ref[...] = jnp.zeros_like(out_ref)

    def accumulate(mask):
        part = jnp.zeros((_SUBLANES, _LANES), jnp.float32)
        for i in range(n):
            a = alpha_ref[i].astype(jnp.float32)          # (B, 8, 128)
            t = trimap_ref[i].astype(jnp.float32)
            # pred_alpha.where(trimap < 0.66, 1.0).where(trimap > 0.33, 0.0)
            a = jnp.where(t < jnp.float32(0.66), a, jnp.float32(1.0))
            a = jnp.where(t > jnp.float32(0.33), a, jnp.float32(0.0))
            one_minus_a = jnp.float32(1.0) - a
            for j in range(c):
                d = (fg_ref[i * c + j].astype(jnp.float32) * a
                     + bg_ref[i * c + j].astype(jnp.float32) * one_minus_a
                     - tgt_ref[i * c + j].astype(jnp.float32))
                sq = d * d
                if mask is not None:
                    sq = jnp.where(mask, sq, jnp.float32(0.0))
                # Reduce over the leading (tile) axis: pure vreg-wise VPU adds.
                part = part + jnp.sum(sq, axis=0)
        out_ref[...] += part

    if tail_possible:
        # Only the last logical block (ragged G % B) or a duplicated block
        # from the 2-TensorCore slice split can reach past the valid tiles.
        is_tail = (blk + 1) * grps_per_block > total_grps

        @pl.when(jnp.logical_not(is_tail))
        def _fast():
            accumulate(None)

        @pl.when(is_tail)
        def _masked():
            gg = blk * grps_per_block + jax.lax.broadcasted_iota(
                jnp.int32, (grps_per_block, _SUBLANES, _LANES), 0)
            accumulate(gg < total_grps)
    else:
        accumulate(None)


def alpha_matte_loss(pred_alpha, pred_trimap, fg, bg, target_pile,
                     *, block_grps=None, force_num_slices=None):
    """MSE( fg*alpha' + bg*(1-alpha'), target ), alpha' trimap-clamped."""
    n, c, h, w = fg.shape
    p = h * w
    assert pred_alpha.shape == (n, 1, h, w)
    assert pred_trimap.shape == (n, 1, h, w)
    assert bg.shape == fg.shape and target_pile.shape == fg.shape

    n_cores, budget, vmem_limit = _tpu_config()
    itemsize = max(jnp.dtype(x.dtype).itemsize
                   for x in (pred_alpha, pred_trimap, fg, bg, target_pile))

    # Dense packing: flatten H*W, pad (rarely) to a whole (8,128) tile, and
    # view every plane as a stack of tiles.  All reshapes are free; zero
    # padding contributes exactly 0 to the squared error (see header).
    p_pad = _round_up(p, _GRP)
    g = p_pad // _GRP

    def pack(x, ch):
        x = x.reshape(n * ch, p)
        if p_pad != p:
            x = jnp.pad(x, ((0, 0), (0, p_pad - p)))
        return x.reshape(n * ch, g, _SUBLANES, _LANES)

    alpha4 = pack(pred_alpha, 1)
    trimap4 = pack(pred_trimap, 1)
    fg4, bg4, tgt4 = pack(fg, c), pack(bg, c), pack(target_pile, c)

    b_grp = block_grps if block_grps is not None else \
        _choose_grps_per_block(n, c, g, itemsize, budget)
    b_grp = max(1, min(b_grp, g))

    total_steps = pl.cdiv(g, b_grp)
    if force_num_slices is not None:
        num_slices = force_num_slices
    else:
        num_slices = 2 if (n_cores == 2 and total_steps >= 2) else 1
    steps_per_slice = pl.cdiv(total_steps, num_slices)
    last_blk = total_steps - 1
    tail_possible = num_slices * steps_per_slice * b_grp > g

    def in_map(si, ki):
        blk = jnp.minimum(si * steps_per_slice + ki, last_blk)
        return (0, blk, 0, 0)

    kernel = functools.partial(
        _alpha_matte_loss_kernel, n=n, c=c, grps_per_block=b_grp,
        steps_per_slice=steps_per_slice, total_grps=g,
        tail_possible=tail_possible)

    partials = pl.pallas_call(
        kernel,
        out_shape=jax.ShapeDtypeStruct((num_slices * _SUBLANES, _LANES),
                                       jnp.float32),
        grid=(num_slices, steps_per_slice),
        in_specs=[
            pl.BlockSpec((n, b_grp, _SUBLANES, _LANES), in_map),      # alpha
            pl.BlockSpec((n, b_grp, _SUBLANES, _LANES), in_map),      # trimap
            pl.BlockSpec((n * c, b_grp, _SUBLANES, _LANES), in_map),  # fg
            pl.BlockSpec((n * c, b_grp, _SUBLANES, _LANES), in_map),  # bg
            pl.BlockSpec((n * c, b_grp, _SUBLANES, _LANES), in_map),  # target
        ],
        out_specs=pl.BlockSpec((_SUBLANES, _LANES), lambda si, ki: (si, 0)),
        compiler_params=pltpu.CompilerParams(
            # TODO(synk): on v7x, verify "parallel" shards the slice axis across
            # both TensorCores; switch to pltpu.CORE_PARALLEL if it does not.
            dimension_semantics=("parallel", "arbitrary"),
            vmem_limit_bytes=vmem_limit,
        ),
    )(alpha4, trimap4, fg4, bg4, tgt4)

    return jnp.sum(partials) / jnp.float32(n * c * h * w)


def _reference(pred_alpha, pred_trimap, fg, bg, target_pile):
    a = jnp.where(pred_trimap < 0.66, pred_alpha, 1.0)
    a = jnp.where(pred_trimap > 0.33, a, 0.0)
    pile = fg * a + bg * (1.0 - a)
    return jnp.mean((pile - target_pile) ** 2)


if __name__ == "__main__":
    key = jax.random.PRNGKey(0)
    k = jax.random.split(key, 5)
    N, C, H, W = 2, 3, 16, 16
    pred_alpha = jax.random.uniform(k[0], (N, 1, H, W), dtype=jnp.float32)
    pred_trimap = jax.random.uniform(k[1], (N, 1, H, W), dtype=jnp.float32)
    fg = jax.random.uniform(k[2], (N, C, H, W), dtype=jnp.float32)
    bg = jax.random.uniform(k[3], (N, C, H, W), dtype=jnp.float32)
    tgt = jax.random.uniform(k[4], (N, C, H, W), dtype=jnp.float32)

    loss = jax.block_until_ready(
        alpha_matte_loss(pred_alpha, pred_trimap, fg, bg, tgt))
    ref = _reference(pred_alpha, pred_trimap, fg, bg, tgt)
    assert jnp.allclose(loss, ref, rtol=1e-5, atol=1e-6), (loss, ref)

    # 2) Ragged tile count + forced small block: multi-step accumulation and
    #    the gated tail mask (edge block of the tile axis is partially OOB).
    k2 = jax.random.split(jax.random.PRNGKey(1), 5)
    N2, C2, H2, W2 = 2, 3, 48, 48        # H*W = 2304 -> 3 (8,128) tiles/plane
    a2 = jax.random.uniform(k2[0], (N2, 1, H2, W2), dtype=jnp.float32)
    t2 = jax.random.uniform(k2[1], (N2, 1, H2, W2), dtype=jnp.float32)
    fg2 = jax.random.uniform(k2[2], (N2, C2, H2, W2), dtype=jnp.float32)
    bg2 = jax.random.uniform(k2[3], (N2, C2, H2, W2), dtype=jnp.float32)
    tg2 = jax.random.uniform(k2[4], (N2, C2, H2, W2), dtype=jnp.float32)
    loss2 = jax.block_until_ready(
        alpha_matte_loss(a2, t2, fg2, bg2, tg2, block_grps=2))
    ref2 = _reference(a2, t2, fg2, bg2, tg2)
    assert jnp.allclose(loss2, ref2, rtol=1e-5, atol=1e-6), (loss2, ref2)

    # 3) Forced 2-slice split with a single real step: exercises the fully
    #    masked duplicated tail block that the v7x two-TensorCore path can hit.
    loss3 = jax.block_until_ready(
        alpha_matte_loss(pred_alpha, pred_trimap, fg, bg, tgt,
                         block_grps=1, force_num_slices=2))
    assert jnp.allclose(loss3, ref, rtol=1e-5, atol=1e-6), (loss3, ref)

    print("KERNEL_OK")
</pallas_src>

<mosaic_0001>
module attributes {stable_mosaic.version = 11 : i64} {
  func.func @_alpha_matte_loss_kernel(%arg0: i32, %arg1: i32, %arg2: memref<2x1x8x128xf32, #tpu.memory_space<vmem>>, %arg3: memref<2x1x8x128xf32, #tpu.memory_space<vmem>>, %arg4: memref<6x1x8x128xf32, #tpu.memory_space<vmem>>, %arg5: memref<6x1x8x128xf32, #tpu.memory_space<vmem>>, %arg6: memref<6x1x8x128xf32, #tpu.memory_space<vmem>>, %arg7: memref<8x128xf32, #tpu.memory_space<vmem>>) attributes {dimension_semantics = [#tpu.dimension_semantics<parallel>, #tpu.dimension_semantics<arbitrary>], iteration_bounds = array<i64: 1, 1>, scalar_prefetch = 0 : i64, scratch_operands = 0 : i64, tpu.core_type = #tpu.core_type<tc>, window_params = [{transform_indices = @transform_0, window_bounds = array<i64: 2, 1, 8, 128>}, {transform_indices = @transform_1, window_bounds = array<i64: 2, 1, 8, 128>}, {transform_indices = @transform_2, window_bounds = array<i64: 6, 1, 8, 128>}, {transform_indices = @transform_3, window_bounds = array<i64: 6, 1, 8, 128>}, {transform_indices = @transform_4, window_bounds = array<i64: 6, 1, 8, 128>}, {transform_indices = @transform_5, window_bounds = array<i64: 8, 128>}]} {
    %c0_i32 = arith.constant 0 : i32
    %0 = arith.cmpi eq, %arg1, %c0_i32 : i32
    %1 = arith.extui %0 : i1 to i32
    %c0_i32_0 = arith.constant 0 : i32
    %2 = arith.cmpi ne, %1, %c0_i32_0 : i32
    scf.if %2 {
      %cst_103 = arith.constant 0.000000e+00 : f32
      %113 = vector.broadcast %cst_103 : f32 to vector<8x128xf32>
      %c0_104 = arith.constant 0 : index
      %c0_105 = arith.constant 0 : index
      %114 = vector.load %arg7[%c0_104, %c0_105] : memref<8x128xf32, #tpu.memory_space<vmem>>, vector<8x128xf32>
      tpu.vector_store %arg7[%c0_104, %c0_105], %113 {strides = array<i32>} : memref<8x128xf32, #tpu.memory_space<vmem>>, vector<8x128xf32>,
    } else {
    }
    %cst = arith.constant 0.000000e+00 : f32
    %3 = vector.broadcast %cst : f32 to vector<8x128xf32>
    %c0 = arith.constant 0 : index
    %c0_1 = arith.constant 0 : index
    %c0_2 = arith.constant 0 : index
    %c0_3 = arith.constant 0 : index
    %4 = vector.load %arg2[%c0, %c0_1, %c0_2, %c0_3] : memref<2x1x8x128xf32, #tpu.memory_space<vmem>>, vector<1x1x8x128xf32>
    %5 = vector.shape_cast %4 : vector<1x1x8x128xf32> to vector<1x8x128xf32>
    %c0_4 = arith.constant 0 : index
    %c0_5 = arith.constant 0 : index
    %c0_6 = arith.constant 0 : index
    %c0_7 = arith.constant 0 : index
    %6 = vector.load %arg3[%c0_4, %c0_5, %c0_6, %c0_7] : memref<2x1x8x128xf32, #tpu.memory_space<vmem>>, vector<1x1x8x128xf32>
    %7 = vector.shape_cast %6 : vector<1x1x8x128xf32> to vector<1x8x128xf32>
    %cst_8 = arith.constant 6.600000e-01 : f32
    %8 = vector.broadcast %cst_8 : f32 to vector<1x8x128xf32>
    %9 = arith.cmpf olt, %7, %8 : vector<1x8x128xf32>
    %cst_9 = arith.constant 1.000000e+00 : f32
    %10 = vector.broadcast %cst_9 : f32 to vector<1x8x128xf32>
    %11 = arith.select %9, %5, %10 : vector<1x8x128xi1>, vector<1x8x128xf32>
    %cst_10 = arith.constant 3.300000e-01 : f32
    %12 = vector.broadcast %cst_10 : f32 to vector<1x8x128xf32>
    %13 = arith.cmpf ogt, %7, %12 : vector<1x8x128xf32>
    %cst_11 = arith.constant 0.000000e+00 : f32
    %14 = vector.broadcast %cst_11 : f32 to vector<1x8x128xf32>
    %15 = arith.select %13, %11, %14 : vector<1x8x128xi1>, vector<1x8x128xf32>
    %cst_12 = arith.constant 1.000000e+00 : f32
    %16 = vector.broadcast %cst_12 : f32 to vector<1x8x128xf32>
    %17 = arith.subf %16, %15 : vector<1x8x128xf32>
    %c0_13 = arith.constant 0 : index
    %c0_14 = arith.constant 0 : index
    %c0_15 = arith.constant 0 : index
    %c0_16 = arith.constant 0 : index
    %18 = vector.load %arg4[%c0_13, %c0_14, %c0_15, %c0_16] : memref<6x1x8x128xf32, #tpu.memory_space<vmem>>, vector<1x1x8x128xf32>
    %19 = vector.shape_cast %18 : vector<1x1x8x128xf32> to vector<1x8x128xf32>
    %20 = arith.mulf %19, %15 : vector<1x8x128xf32>
    %c0_17 = arith.constant 0 : index
    %c0_18 = arith.constant 0 : index
    %c0_19 = arith.constant 0 : index
    %c0_20 = arith.constant 0 : index
    %21 = vector.load %arg5[%c0_17, %c0_18, %c0_19, %c0_20] : memref<6x1x8x128xf32, #tpu.memory_space<vmem>>, vector<1x1x8x128xf32>
    %22 = vector.shape_cast %21 : vector<1x1x8x128xf32> to vector<1x8x128xf32>
    %23 = arith.mulf %22, %17 : vector<1x8x128xf32>
    %24 = arith.addf %20, %23 : vector<1x8x128xf32>
    %c0_21 = arith.constant 0 : index
    %c0_22 = arith.constant 0 : index
    %c0_23 = arith.constant 0 : index
    %c0_24 = arith.constant 0 : index
    %25 = vector.load %arg6[%c0_21, %c0_22, %c0_23, %c0_24] : memref<6x1x8x128xf32, #tpu.memory_space<vmem>>, vector<1x1x8x128xf32>
    %26 = vector.shape_cast %25 : vector<1x1x8x128xf32> to vector<1x8x128xf32>
    %27 = arith.subf %24, %26 : vector<1x8x128xf32>
    %28 = arith.mulf %27, %27 : vector<1x8x128xf32>
    %cst_25 = arith.constant dense<0.000000e+00> : vector<8x128xf32>
    %29 = vector.multi_reduction <add>, %28, %cst_25 [0] : vector<1x8x128xf32> to vector<8x128xf32>
    %30 = arith.addf %3, %29 : vector<8x128xf32>
    %c1 = arith.constant 1 : index
    %c0_26 = arith.constant 0 : index
    %c0_27 = arith.constant 0 : index
    %c0_28 = arith.constant 0 : index
    %31 = vector.load %arg4[%c1, %c0_26, %c0_27, %c0_28] : memref<6x1x8x128xf32, #tpu.memory_space<vmem>>, vector<1x1x8x128xf32>
    %32 = vector.shape_cast %31 : vector<1x1x8x128xf32> to vector<1x8x128xf32>
    %33 = arith.mulf %32, %15 : vector<1x8x128xf32>
    %c1_29 = arith.constant 1 : index
    %c0_30 = arith.constant 0 : index
    %c0_31 = arith.constant 0 : index
    %c0_32 = arith.constant 0 : index
    %34 = vector.load %arg5[%c1_29, %c0_30, %c0_31, %c0_32] : memref<6x1x8x128xf32, #tpu.memory_space<vmem>>, vector<1x1x8x128xf32>
    %35 = vector.shape_cast %34 : vector<1x1x8x128xf32> to vector<1x8x128xf32>
    %36 = arith.mulf %35, %17 : vector<1x8x128xf32>
    %37 = arith.addf %33, %36 : vector<1x8x128xf32>
    %c1_33 = arith.constant 1 : index
    %c0_34 = arith.constant 0 : index
    %c0_35 = arith.constant 0 : index
    %c0_36 = arith.constant 0 : index
    %38 = vector.load %arg6[%c1_33, %c0_34, %c0_35, %c0_36] : memref<6x1x8x128xf32, #tpu.memory_space<vmem>>, vector<1x1x8x128xf32>
    %39 = vector.shape_cast %38 : vector<1x1x8x128xf32> to vector<1x8x128xf32>
    %40 = arith.subf %37, %39 : vector<1x8x128xf32>
    %41 = arith.mulf %40, %40 : vector<1x8x128xf32>
    %cst_37 = arith.constant dense<0.000000e+00> : vector<8x128xf32>
    %42 = vector.multi_reduction <add>, %41, %cst_37 [0] : vector<1x8x128xf32> to vector<8x128xf32>
    %43 = arith.addf %30, %42 : vector<8x128xf32>
    %c2 = arith.constant 2 : index
    %c0_38 = arith.constant 0 : index
    %c0_39 = arith.constant 0 : index
    %c0_40 = arith.constant 0 : index
    %44 = vector.load %arg4[%c2, %c0_38, %c0_39, %c0_40] : memref<6x1x8x128xf32, #tpu.memory_space<vmem>>, vector<1x1x8x128xf32>
    %45 = vector.shape_cast %44 : vector<1x1x8x128xf32> to vector<1x8x128xf32>
    %46 = arith.mulf %45, %15 : vector<1x8x128xf32>
    %c2_41 = arith.constant 2 : index
    %c0_42 = arith.constant 0 : index
    %c0_43 = arith.constant 0 : index
    %c0_44 = arith.constant 0 : index
    %47 = vector.load %arg5[%c2_41, %c0_42, %c0_43, %c0_44] : memref<6x1x8x128xf32, #tpu.memory_space<vmem>>, vector<1x1x8x128xf32>
    %48 = vector.shape_cast %47 : vector<1x1x8x128xf32> to vector<1x8x128xf32>
    %49 = arith.mulf %48, %17 : vector<1x8x128xf32>
    %50 = arith.addf %46, %49 : vector<1x8x128xf32>
    %c2_45 = arith.constant 2 : index
    %c0_46 = arith.constant 0 : index
    %c0_47 = arith.constant 0 : index
    %c0_48 = arith.constant 0 : index
    %51 = vector.load %arg6[%c2_45, %c0_46, %c0_47, %c0_48] : memref<6x1x8x128xf32, #tpu.memory_space<vmem>>, vector<1x1x8x128xf32>
    %52 = vector.shape_cast %51 : vector<1x1x8x128xf32> to vector<1x8x128xf32>
    %53 = arith.subf %50, %52 : vector<1x8x128xf32>
    %54 = arith.mulf %53, %53 : vector<1x8x128xf32>
    %cst_49 = arith.constant dense<0.000000e+00> : vector<8x128xf32>
    %55 = vector.multi_reduction <add>, %54, %cst_49 [0] : vector<1x8x128xf32> to vector<8x128xf32>
    %56 = arith.addf %43, %55 : vector<8x128xf32>
    %c1_50 = arith.constant 1 : index
    %c0_51 = arith.constant 0 : index
    %c0_52 = arith.constant 0 : index
    %c0_53 = arith.constant 0 : index
    %57 = vector.load %arg2[%c1_50, %c0_51, %c0_52, %c0_53] : memref<2x1x8x128xf32, #tpu.memory_space<vmem>>, vector<1x1x8x128xf32>
    %58 = vector.shape_cast %57 : vector<1x1x8x128xf32> to vector<1x8x128xf32>
    %c1_54 = arith.constant 1 : index
    %c0_55 = arith.constant 0 : index
    %c0_56 = arith.constant 0 : index
    %c0_57 = arith.constant 0 : index
    %59 = vector.load %arg3[%c1_54, %c0_55, %c0_56, %c0_57] : memref<2x1x8x128xf32, #tpu.memory_space<vmem>>, vector<1x1x8x128xf32>
    %60 = vector.shape_cast %59 : vector<1x1x8x128xf32> to vector<1x8x128xf32>
    %cst_58 = arith.constant 6.600000e-01 : f32
    %61 = vector.broadcast %cst_58 : f32 to vector<1x8x128xf32>
    %62 = arith.cmpf olt, %60, %61 : vector<1x8x128xf32>
    %cst_59 = arith.constant 1.000000e+00 : f32
    %63 = vector.broadcast %cst_59 : f32 to vector<1x8x128xf32>
    %64 = arith.select %62, %58, %63 : vector<1x8x128xi1>, vector<1x8x128xf32>
    %cst_60 = arith.constant 3.300000e-01 : f32
    %65 = vector.broadcast %cst_60 : f32 to vector<1x8x128xf32>
    %66 = arith.cmpf ogt, %60, %65 : vector<1x8x128xf32>
    %cst_61 = arith.constant 0.000000e+00 : f32
    %67 = vector.broadcast %cst_61 : f32 to vector<1x8x128xf32>
    %68 = arith.select %66, %64, %67 : vector<1x8x128xi1>, vector<1x8x128xf32>
    %cst_62 = arith.constant 1.000000e+00 : f32
    %69 = vector.broadcast %cst_62 : f32 to vector<1x8x128xf32>
    %70 = arith.subf %69, %68 : vector<1x8x128xf32>
    %c3 = arith.constant 3 : index
    %c0_63 = arith.constant 0 : index
    %c0_64 = arith.constant 0 : index
    %c0_65 = arith.constant 0 : index
    %71 = vector.load %arg4[%c3, %c0_63, %c0_64, %c0_65] : memref<6x1x8x128xf32, #tpu.memory_space<vmem>>, vector<1x1x8x128xf32>
    %72 = vector.shape_cast %71 : vector<1x1x8x128xf32> to vector<1x8x128xf32>
    %73 = arith.mulf %72, %68 : vector<1x8x128xf32>
    %c3_66 = arith.constant 3 : index
    %c0_67 = arith.constant 0 : index
    %c0_68 = arith.constant 0 : index
    %c0_69 = arith.constant 0 : index
    %74 = vector.load %arg5[%c3_66, %c0_67, %c0_68, %c0_69] : memref<6x1x8x128xf32, #tpu.memory_space<vmem>>, vector<1x1x8x128xf32>
    %75 = vector.shape_cast %74 : vector<1x1x8x128xf32> to vector<1x8x128xf32>
    %76 = arith.mulf %75, %70 : vector<1x8x128xf32>
    %77 = arith.addf %73, %76 : vector<1x8x128xf32>
    %c3_70 = arith.constant 3 : index
    %c0_71 = arith.constant 0 : index
    %c0_72 = arith.constant 0 : index
    %c0_73 = arith.constant 0 : index
    %78 = vector.load %arg6[%c3_70, %c0_71, %c0_72, %c0_73] : memref<6x1x8x128xf32, #tpu.memory_space<vmem>>, vector<1x1x8x128xf32>
    %79 = vector.shape_cast %78 : vector<1x1x8x128xf32> to vector<1x8x128xf32>
    %80 = arith.subf %77, %79 : vector<1x8x128xf32>
    %81 = arith.mulf %80, %80 : vector<1x8x128xf32>
    %cst_74 = arith.constant dense<0.000000e+00> : vector<8x128xf32>
    %82 = vector.multi_reduction <add>, %81, %cst_74 [0] : vector<1x8x128xf32> to vector<8x128xf32>
    %83 = arith.addf %56, %82 : vector<8x128xf32>
    %c4 = arith.constant 4 : index
    %c0_75 = arith.constant 0 : index
    %c0_76 = arith.constant 0 : index
    %c0_77 = arith.constant 0 : index
    %84 = vector.load %arg4[%c4, %c0_75, %c0_76, %c0_77] : memref<6x1x8x128xf32, #tpu.memory_space<vmem>>, vector<1x1x8x128xf32>
    %85 = vector.shape_cast %84 : vector<1x1x8x128xf32> to vector<1x8x128xf32>
    %86 = arith.mulf %85, %68 : vector<1x8x128xf32>
    %c4_78 = arith.constant 4 : index
    %c0_79 = arith.constant 0 : index
    %c0_80 = arith.constant 0 : index
    %c0_81 = arith.constant 0 : index
    %87 = vector.load %arg5[%c4_78, %c0_79, %c0_80, %c0_81] : memref<6x1x8x128xf32, #tpu.memory_space<vmem>>, vector<1x1x8x128xf32>
    %88 = vector.shape_cast %87 : vector<1x1x8x128xf32> to vector<1x8x128xf32>
    %89 = arith.mulf %88, %70 : vector<1x8x128xf32>
    %90 = arith.addf %86, %89 : vector<1x8x128xf32>
    %c4_82 = arith.constant 4 : index
    %c0_83 = arith.constant 0 : index
    %c0_84 = arith.constant 0 : index
    %c0_85 = arith.constant 0 : index
    %91 = vector.load %arg6[%c4_82, %c0_83, %c0_84, %c0_85] : memref<6x1x8x128xf32, #tpu.memory_space<vmem>>, vector<1x1x8x128xf32>
    %92 = vector.shape_cast %91 : vector<1x1x8x128xf32> to vector<1x8x128xf32>
    %93 = arith.subf %90, %92 : vector<1x8x128xf32>
    %94 = arith.mulf %93, %93 : vector<1x8x128xf32>
    %cst_86 = arith.constant dense<0.000000e+00> : vector<8x128xf32>
    %95 = vector.multi_reduction <add>, %94, %cst_86 [0] : vector<1x8x128xf32> to vector<8x128xf32>
    %96 = arith.addf %83, %95 : vector<8x128xf32>
    %c5 = arith.constant 5 : index
    %c0_87 = arith.constant 0 : index
    %c0_88 = arith.constant 0 : index
    %c0_89 = arith.constant 0 : index
    %97 = vector.load %arg4[%c5, %c0_87, %c0_88, %c0_89] : memref<6x1x8x128xf32, #tpu.memory_space<vmem>>, vector<1x1x8x128xf32>
    %98 = vector.shape_cast %97 : vector<1x1x8x128xf32> to vector<1x8x128xf32>
    %99 = arith.mulf %98, %68 : vector<1x8x128xf32>
    %c5_90 = arith.constant 5 : index
    %c0_91 = arith.constant 0 : index
    %c0_92 = arith.constant 0 : index
    %c0_93 = arith.constant 0 : index
    %100 = vector.load %arg5[%c5_90, %c0_91, %c0_92, %c0_93] : memref<6x1x8x128xf32, #tpu.memory_space<vmem>>, vector<1x1x8x128xf32>
    %101 = vector.shape_cast %100 : vector<1x1x8x128xf32> to vector<1x8x128xf32>
    %102 = arith.mulf %101, %70 : vector<1x8x128xf32>
    %103 = arith.addf %99, %102 : vector<1x8x128xf32>
    %c5_94 = arith.constant 5 : index
    %c0_95 = arith.constant 0 : index
    %c0_96 = arith.constant 0 : index
    %c0_97 = arith.constant 0 : index
    %104 = vector.load %arg6[%c5_94, %c0_95, %c0_96, %c0_97] : memref<6x1x8x128xf32, #tpu.memory_space<vmem>>, vector<1x1x8x128xf32>
    %105 = vector.shape_cast %104 : vector<1x1x8x128xf32> to vector<1x8x128xf32>
    %106 = arith.subf %103, %105 : vector<1x8x128xf32>
    %107 = arith.mulf %106, %106 : vector<1x8x128xf32>
    %cst_98 = arith.constant dense<0.000000e+00> : vector<8x128xf32>
    %108 = vector.multi_reduction <add>, %107, %cst_98 [0] : vector<1x8x128xf32> to vector<8x128xf32>
    %109 = arith.addf %96, %108 : vector<8x128xf32>
    %c0_99 = arith.constant 0 : index
    %c0_100 = arith.constant 0 : index
    %110 = vector.load %arg7[%c0_99, %c0_100] : memref<8x128xf32, #tpu.memory_space<vmem>>, vector<8x128xf32>
    %111 = arith.addf %110, %109 : vector<8x128xf32>
    %c0_101 = arith.constant 0 : index
    %c0_102 = arith.constant 0 : index
    %112 = vector.load %arg7[%c0_101, %c0_102] : memref<8x128xf32, #tpu.memory_space<vmem>>, vector<8x128xf32>
    tpu.vector_store %arg7[%c0_101, %c0_102], %111 {strides = array<i32>} : memref<8x128xf32, #tpu.memory_space<vmem>>, vector<8x128xf32>,
    return
  }
  func.func @transform_0(%arg0: i32, %arg1: i32) -> (i32, i32, i32, i32) {
    %c1_i32 = arith.constant 1 : i32
    %0 = arith.muli %arg0, %c1_i32 : i32
    %1 = arith.addi %0, %arg1 : i32
    %c0_i32 = arith.constant 0 : i32
    %2 = arith.minsi %1, %c0_i32 : i32
    %c0_i32_0 = arith.constant 0 : i32
    %c0_i32_1 = arith.constant 0 : i32
    %c0_i32_2 = arith.constant 0 : i32
    %c0_i32_3 = arith.constant 0 : i32
    return %c0_i32_0, %2, %c0_i32_1, %c0_i32_2 : i32, i32, i32, i32
  }
  func.func @transform_1(%arg0: i32, %arg1: i32) -> (i32, i32, i32, i32) {
    %c1_i32 = arith.constant 1 : i32
    %0 = arith.muli %arg0, %c1_i32 : i32
    %1 = arith.addi %0, %arg1 : i32
    %c0_i32 = arith.constant 0 : i32
    %2 = arith.minsi %1, %c0_i32 : i32
    %c0_i32_0 = arith.constant 0 : i32
    %c0_i32_1 = arith.constant 0 : i32
    %c0_i32_2 = arith.constant 0 : i32
    %c0_i32_3 = arith.constant 0 : i32
    return %c0_i32_0, %2, %c0_i32_1, %c0_i32_2 : i32, i32, i32, i32
  }
  func.func @transform_2(%arg0: i32, %arg1: i32) -> (i32, i32, i32, i32) {
    %c1_i32 = arith.constant 1 : i32
    %0 = arith.muli %arg0, %c1_i32 : i32
    %1 = arith.addi %0, %arg1 : i32
    %c0_i32 = arith.constant 0 : i32
    %2 = arith.minsi %1, %c0_i32 : i32
    %c0_i32_0 = arith.constant 0 : i32
    %c0_i32_1 = arith.constant 0 : i32
    %c0_i32_2 = arith.constant 0 : i32
    %c0_i32_3 = arith.constant 0 : i32
    return %c0_i32_0, %2, %c0_i32_1, %c0_i32_2 : i32, i32, i32, i32
  }
  func.func @transform_3(%arg0: i32, %arg1: i32) -> (i32, i32, i32, i32) {
    %c1_i32 = arith.constant 1 : i32
    %0 = arith.muli %arg0, %c1_i32 : i32
    %1 = arith.addi %0, %arg1 : i32
    %c0_i32 = arith.constant 0 : i32
    %2 = arith.minsi %1, %c0_i32 : i32
    %c0_i32_0 = arith.constant 0 : i32
    %c0_i32_1 = arith.constant 0 : i32
    %c0_i32_2 = arith.constant 0 : i32
    %c0_i32_3 = arith.constant 0 : i32
    return %c0_i32_0, %2, %c0_i32_1, %c0_i32_2 : i32, i32, i32, i32
  }
  func.func @transform_4(%arg0: i32, %arg1: i32) -> (i32, i32, i32, i32) {
    %c1_i32 = arith.constant 1 : i32
    %0 = arith.muli %arg0, %c1_i32 : i32
    %1 = arith.addi %0, %arg1 : i32
    %c0_i32 = arith.constant 0 : i32
    %2 = arith.minsi %1, %c0_i32 : i32
    %c0_i32_0 = arith.constant 0 : i32
    %c0_i32_1 = arith.constant 0 : i32
    %c0_i32_2 = arith.constant 0 : i32
    %c0_i32_3 = arith.constant 0 : i32
    return %c0_i32_0, %2, %c0_i32_1, %c0_i32_2 : i32, i32, i32, i32
  }
  func.func @transform_5(%arg0: i32, %arg1: i32) -> (i32, i32) {
    %c0_i32 = arith.constant 0 : i32
    %c0_i32_0 = arith.constant 0 : i32
    return %arg0, %c0_i32 : i32, i32
  }
}

</mosaic_0001>

<bundles_post_ra>
// kernel: tpu_custom_call.1
= control target key start
LH: loop header
LB: loop body
LE: loop exit
PB: predicated region body
PF: predicated region fallthrough
CT: control target
= control target key end

     0   :  { %10 = vsyncpa [#allocation3], 0  ;;  %s463_s0 = inlined_call_operand.hbm [shape: f32[2,1,8,128], index: 0, kind: input, shape index: {}]   ;;  %s464_s1 = inlined_call_operand.hbm [shape: f32[2,1,8,128], index: 1, kind: input, shape index: {}]   ;;  %s465_s2 = inlined_call_operand.hbm [shape: f32[6,1,8,128], index: 2, kind: input, shape index: {}]   ;;  %s466_s3 = inlined_call_operand.hbm [shape: f32[6,1,8,128], index: 3, kind: input, shape index: {}]   ;;  %s467_s4 = inlined_call_operand.hbm [shape: f32[6,1,8,128], index: 4, kind: input, shape index: {}]   ;;  %s468_s5 = inlined_call_operand.hbm [shape: f32[8,128], index: 5, kind: output, shape index: {}]  }
   0x1   :  { %11 = vsyncpa [#allocation6], 0 }
   0x2   :  { %12 = vsyncpa [#allocation9], 0 }
   0x3   :  { %13 = vsyncpa [#allocation4], 0  ;;  %s392_s18 = smov [#allocation5]   ;;  %s393_s20 = smov [#allocation8]  }
   0x4   :  { %s41_s19 = sshll.u32 %s392_s18, 4  ;;  %s75_s21 = sshll.u32 %s393_s20, 4  ;;  %s42_s19 = int_to_ptr.vmem [resolvable:$true] %s41_s19  ;;  %s76_s21 = int_to_ptr.vmem [resolvable:$true] %s75_s21 }
   0x5   :  { %s272_s22 = scalar_lea.vmem %s42_s19, 256  ;;  %p277_p1 = scmp.lt.s32.totalorder %s42_s19, %s42_s19 }
   0x6   :  { %p273_p0 = scmp.ne.s32.totalorder %s42_s19, %s272_s22  ;;  %p278_p2 = scmp.lt.s32.totalorder %s272_s22, %s272_s22 }
   0x8   :  { %p279_p3 = por %p278_p2, %p277_p1 }
   0xa   :  { %p280_p4 = pnand %p279_p3, %p273_p0 }
   0xc   :  { %283 = shalt.err (!%p280_p4)
}
   0xd   :  { %s394_s23 = smov 128   ;;  %s395_s24 = smov 8  }
   0xe   :  { %47 = dma.hbm_to_vmem [thread:$0]  %s464_s1, 256, %s42_s19, [#allocation6], %s394_s23, %s394_s23, %s395_s24  }
   0xf   :  { %s292_s27 = scalar_lea.vmem %s76_s21, 768  ;;  %p297_p6 = scmp.lt.s32.totalorder %s76_s21, %s76_s21 }
  0x10   :  { %p293_p5 = scmp.ne.s32.totalorder %s76_s21, %s292_s27  ;;  %p298_p7 = scmp.lt.s32.totalorder %s292_s27, %s292_s27 }
  0x12   :  { %p299_p8 = por %p298_p7, %p297_p6 }
  0x14   :  { %p300_p9 = pnand %p299_p8, %p293_p5 }
  0x16   :  { %303 = shalt.err (!%p300_p9)
}
  0x17   :  { %81 = dma.hbm_to_vmem [thread:$0]  %s466_s3, 768, %s76_s21, [#allocation9], %s394_s23, %s394_s23, %s395_s24  }
  0x18   :  { %s396_s30 = smov [#allocation2]   ;;  %s397_s7 = smov [#allocation7]  }
  0x19   :  { %s24_s6 = sshll.u32 %s396_s30, 4  ;;  %s58_s8 = sshll.u32 %s397_s7, 4  ;;  %s25_s6 = int_to_ptr.vmem [resolvable:$true] %s24_s6  ;;  %s59_s8 = int_to_ptr.vmem [resolvable:$true] %s58_s8 }
  0x1a   :  { %s312_s1 = scalar_lea.vmem %s25_s6, 256  ;;  %p317_p11 = scmp.lt.s32.totalorder %s25_s6, %s25_s6 }
  0x1b   :  { %p313_p10 = scmp.ne.s32.totalorder %s25_s6, %s312_s1  ;;  %p318_p12 = scmp.lt.s32.totalorder %s312_s1, %s312_s1 }
  0x1d   :  { %p319_p13 = por %p318_p12, %p317_p11 }
  0x1f   :  { %p320_p0 = pnand %p319_p13, %p313_p10 }
  0x21   :  { %323 = shalt.err (!%p320_p0)
}
  0x22   :  { %30 = dma.hbm_to_vmem [thread:$0]  %s463_s0, 256, %s25_s6, [#allocation3], %s394_s23, %s394_s23, %s395_s24  }
  0x23   :  { %s332_s3 = scalar_lea.vmem %s59_s8, 768  ;;  %p337_p2 = scmp.lt.s32.totalorder %s59_s8, %s59_s8 }
  0x24   :  { %p333_p1 = scmp.ne.s32.totalorder %s59_s8, %s332_s3  ;;  %p338_p3 = scmp.lt.s32.totalorder %s332_s3, %s332_s3 }
  0x26   :  { %p339_p4 = por %p338_p3, %p337_p2 }
  0x28   :  { %p340_p5 = pnand %p339_p4, %p333_p1 }
  0x2a   :  { %343 = shalt.err (!%p340_p5)
}
  0x2b   :  { %64 = dma.hbm_to_vmem [thread:$0]  %s465_s2, 768, %s59_s8, [#allocation6], %s394_s23, %s394_s23, %s395_s24  }
  0x2c   :  { %s398_s13 = smov [#allocation10]  }
  0x2d   :  { %s92_s14 = sshll.u32 %s398_s13, 4  ;;  %s93_s14 = int_to_ptr.vmem [resolvable:$true] %s92_s14 }
  0x2e   :  { %s352_s15 = scalar_lea.vmem %s93_s14, 768  ;;  %p357_p7 = scmp.lt.s32.totalorder %s93_s14, %s93_s14 }
  0x2f   :  { %p353_p6 = scmp.ne.s32.totalorder %s93_s14, %s352_s15  ;;  %p358_p8 = scmp.lt.s32.totalorder %s352_s15, %s352_s15 }
  0x31   :  { %p359_p9 = por %p358_p8, %p357_p7 }
  0x33   :  { %p360_p10 = pnand %p359_p9, %p353_p6 }
  0x35   :  { %363 = shalt.err (!%p360_p10)
}
  0x36   :  { %98 = dma.hbm_to_vmem [thread:$0]  %s467_s4, 768, %s93_s14, [#allocation9], %s394_s23, %s394_s23, %s395_s24  }
  0x37   :  { %384 = dma.done.wait [#allocation3], 256  }
  0x38   :  { %385 = vsyncadd [#allocation3], 4294967040 }
  0x39   :  { %386 = dma.done.wait [#allocation6], 1024  }
  0x3a   :  { %387 = vsyncadd [#allocation6], 4294966272 }
  0x3b   :  { %388 = dma.done.wait [#allocation9], 1536  }
  0x3c   :  { %389 = vsyncadd [#allocation9], 4294965760  ;;  %v134_v0 = vld [vmem:[#allocation2] sm:$0xff]  ;;  %v135_v1 = vld [vmem:[#allocation5] sm:$0xff]  ;;  %s399_s2 = smov [#allocation11]  }
  0x3d   :  { %vm136_vm0 = vcmp.lt.f32.partialorder %v135_v1, 0.66  ;;  %vm138_vm1 = vcmp.gt.f32.partialorder %v135_v1, 0.33  ;;  %v141_v2 = vld [vmem:[#allocation7] sm:$0xff]  ;;  %v143_v4 = vld [vmem:[#allocation8] sm:$0xff] }
  0x3e   :  { %v137_v3 = vsel %vm136_vm0, %v134_v0, 1.0  ;;  %v152_v5 = vld [vmem:[#allocation7 + $0x8] sm:$0xff]  ;;  %v155_v7 = vld [vmem:[#allocation8 + $0x8] sm:$0xff]  ;;  %v165_v8 = vld [vmem:[#allocation7 + $0x10] sm:$0xff]  ;;  %s234_s4 = sshll.u32 %s399_s2, 4  ;;  %s235_s4 = int_to_ptr.vmem [resolvable:$true] %s234_s4 }
  0x3f   :  { %v139_v6 = vsel %vm138_vm1, %v137_v3, 0.0  ;;  %v168_v9 = vld [vmem:[#allocation8 + $0x10] sm:$0xff]  ;;  %v178_v14 = vld [vmem:[#allocation2 + $0x8] sm:$0xff]  ;;  %v180_v15 = vld [vmem:[#allocation5 + $0x8] sm:$0xff]  ;;  %s364_s17 = scalar_lea.vmem %s235_s4, 128  ;;  %p369_p12 = scmp.lt.s32.totalorder %s235_s4, %s235_s4 }
  0x40   :  { %v140_v10 = vsub.f32 1.0, %v139_v6  ;;  %v142_v11 = vmul.f32 %v141_v2, %v139_v6  ;;  %v153_v12 = vmul.f32 %v152_v5, %v139_v6  ;;  %v166_v13 = vmul.f32 %v165_v8, %v139_v6  ;;  %v146_v16 = vld [vmem:[#allocation10] sm:$0xff]  ;;  %v159_v19 = vld [vmem:[#allocation10 + $0x8] sm:$0xff]  ;;  %v187_v22 = vld [vmem:[#allocation7 + $0x18] sm:$0xff]  ;;  %p365_p11 = scmp.ne.s32.totalorder %s235_s4, %s364_s17  ;;  %p370_p13 = scmp.lt.s32.totalorder %s364_s17, %s364_s17 }
  0x41   :  { %vm181_vm2 = vcmp.lt.f32.partialorder %v180_v15, 0.66  ;;  %vm183_vm3 = vcmp.gt.f32.partialorder %v180_v15, 0.33  ;;  %v200_v23 = vld [vmem:[#allocation7 + $0x20] sm:$0xff]  ;;  %v172_v24 = vld [vmem:[#allocation10 + $0x10] sm:$0xff] }
  0x42   :  { %v144_v17 = vmul.f32 %v143_v4, %v140_v10  ;;  %v156_v18 = vmul.f32 %v155_v7, %v140_v10  ;;  %v169_v20 = vmul.f32 %v168_v9, %v140_v10  ;;  %v182_v21 = vsel %vm181_vm2, %v178_v14, 1.0  ;;  %v190_v26 = vld [vmem:[#allocation8 + $0x18] sm:$0xff]  ;;  %v203_v32 = vld [vmem:[#allocation8 + $0x20] sm:$0xff]  ;;  %v216_v33 = vld [vmem:[#allocation8 + $0x28] sm:$0xff]  ;;  %p371_p0 = por %p370_p13, %p369_p12 }
  0x43   :  { %v184_v25 = vsel %vm183_vm3, %v182_v21, 0.0  ;;  %v213_v27 = vld [vmem:[#allocation7 + $0x28] sm:$0xff]  ;;  %v194_v41 = vld [vmem:[#allocation10 + $0x18] sm:$0xff]  ;;  %v207_v48 = vld [vmem:[#allocation10 + $0x20] sm:$0xff] }
  0x44   :  { %v145_v28 = vadd.f32 %v144_v17, %v142_v11  ;;  %v157_v29 = vadd.f32 %v156_v18, %v153_v12  ;;  %v170_v30 = vadd.f32 %v169_v20, %v166_v13  ;;  %v185_v31 = vsub.f32 1.0, %v184_v25  ;;  %v220_v49 = vld [vmem:[#allocation10 + $0x28] sm:$0xff]  ;;  %p372_p1 = pnand %p371_p0, %p365_p11 }
  0x45   :  { %v188_v34 = vmul.f32 %v187_v22, %v184_v25  ;;  %v201_v35 = vmul.f32 %v200_v23, %v184_v25  ;;  %v214_v36 = vmul.f32 %v213_v27, %v184_v25 }
  0x46   :  { %v147_v37 = vsub.f32 %v145_v28, %v146_v16  ;;  %v160_v38 = vsub.f32 %v157_v29, %v159_v19  ;;  %v173_v39 = vsub.f32 %v170_v30, %v172_v24  ;;  %v191_v40 = vmul.f32 %v190_v26, %v185_v31 }
  0x47   :  { %v204_v42 = vmul.f32 %v203_v32, %v185_v31  ;;  %v217_v43 = vmul.f32 %v216_v33, %v185_v31 }
  0x48   :  { %v148_v44 = vmul.f32 %v147_v37, %v147_v37  ;;  %v161_v45 = vmul.f32 %v160_v38, %v160_v38  ;;  %v174_v46 = vmul.f32 %v173_v39, %v173_v39  ;;  %v192_v47 = vadd.f32 %v191_v40, %v188_v34 }
  0x49   :  { %v205_v50 = vadd.f32 %v204_v42, %v201_v35  ;;  %v218_v51 = vadd.f32 %v217_v43, %v214_v36 }
  0x4a   :  { %v163_v52 = vadd.f32 %v161_v45, %v148_v44  ;;  %v195_v53 = vsub.f32 %v192_v47, %v194_v41 }
  0x4b   :  { %v208_v54 = vsub.f32 %v205_v50, %v207_v48  ;;  %v221_v55 = vsub.f32 %v218_v51, %v220_v49 }
  0x4c   :  { %v176_v56 = vadd.f32 %v174_v46, %v163_v52  ;;  %v196_v57 = vmul.f32 %v195_v53, %v195_v53 }
  0x4d   :  { %v209_v58 = vmul.f32 %v208_v54, %v208_v54  ;;  %v222_v60 = vmul.f32 %v221_v55, %v221_v55 }
  0x4e   :  { %v198_v59 = vadd.f32 %v196_v57, %v176_v56 }
  0x50   :  { %v211_v61 = vadd.f32 %v209_v58, %v198_v59 }
  0x52   :  { %v224_v62 = vadd.f32 %v222_v60, %v211_v61 }
  0x54   :  { %227 = vst [vmem:[#allocation11] sm:$0xff] %v224_v62 }
  0x55   :  { %375 = shalt.err (!%p372_p1)
}
  0x56   :  { %237 = dma.vmem_to_hbm [thread:$0]  %s235_s4, 128, %s468_s5, [#allocation4]  }
  0x57   :  { %390 = dma.done.wait [#allocation4], 128  }
  0x58   :  { %391 = vsyncadd [#allocation4], 4294967168 }
  0x59   :  { %241 = vsyncpa [#allocation3], 1 }
  0x5a   :  { %242 = vsyncpa [#allocation6], 1 }
  0x5b   :  { %243 = vsyncpa [#allocation9], 1 }
  0x5c   :  { %244 = vsyncpa [#allocation4], 1 }

</bundles_post_ra>
